<compile_context>
chip_gen: v5e
topology: v5e:2x2
jax: 0.10.0
libtpu: 0.0.40
codegen_flags: <defaults>
</compile_context>

<pallas_src>
import functools

import jax
import jax.numpy as jnp
from jax import lax
from jax.experimental import pallas as pl
from jax.experimental.pallas import tpu as pltpu

_LANE = 128     # pixels per lane row
_MAX_TQ = 512   # hard cap on sublane rows per grid step (64K pixels)


def _combo_loss_kernel(x_ref, t_ref, out_ref, acc_ref, *,
                       coeffs, delta, num_classes, rs, n_strips):
    """One tile: (C, TQ, 128) logits + (TQ, 128) int32 targets of one (batch, chunk).

    Lane-dense layout: pixels occupy lanes/sublanes; the small class axis leads.
    The tile is processed in RS-row strips, re-reading class planes from VMEM so
    live vregs stay bounded (~6 * RS/8) no matter how big the DMA tile is.
    """
    s = pl.program_id(2)

    @pl.when(s == 0)
    def _init():
        acc_ref[...] = jnp.zeros_like(acc_ref)

    def strip_body(strip, carry):
        r0 = pl.multiple_of(strip * rs, rs)
        tgt = t_ref[pl.ds(r0, rs), :]                                # (RS,128) i32

        # ---- pass 1: fused max + argmax over the class axis ----
        row = x_ref[0, pl.ds(r0, rs), :].astype(jnp.float32)
        row_max = row
        arg = jnp.zeros_like(row)
        for ci in range(1, num_classes):
            row = x_ref[ci, pl.ds(r0, rs), :].astype(jnp.float32)
            gt = row > row_max                     # strict '>' -> first occurrence
            row_max = jnp.where(gt, row, row_max)
            arg = jnp.where(gt, jnp.float32(ci), arg)

        # ---- Huber on argmax vs target (pure VPU; emitted before exp/log so
        #      VALU work overlaps EUP latency on compute-bound chips) ----
        d = arg - tgt.astype(jnp.float32)
        ad = jnp.abs(d)
        hub = jnp.where(ad <= delta, 0.5 * d * d, delta * (ad - 0.5 * delta))

        # ---- pass 2: fused softmax denominator + picked logit ----
        ssum = jnp.zeros_like(row_max)
        picked = jnp.zeros_like(row_max)
        for ci in range(num_classes):
            row = x_ref[ci, pl.ds(r0, rs), :].astype(jnp.float32)
            ssum = ssum + jnp.exp(row - row_max)
            picked = jnp.where(tgt == ci, row, picked)
        ce = jnp.log(ssum) + row_max - picked                        # (RS,128)

        # Padded pixels carry target -1 and contribute zero.
        valid = tgt >= 0
        contrib = jnp.where(valid, coeffs[0] * ce + coeffs[1] * hub,
                            jnp.float32(0.0))
        acc_ref[...] += contrib                                      # lane/sublane accum
        return carry

    lax.fori_loop(0, n_strips, strip_body, 0, unroll=(n_strips <= 8))

    @pl.when(s == pl.num_programs(2) - 1)
    def _finalize():
        out_ref[...] = jnp.sum(acc_ref[...], axis=0, keepdims=True)  # (1,128)


def _largest_divisor_tile(q_rows, cap_rows):
    """Largest multiple-of-8 divisor of q_rows that is <= cap_rows (q_rows % 8 == 0)."""
    t = (cap_rows // 8) * 8
    while t >= 8:
        if q_rows % t == 0:
            return t
        t -= 8
    return 8


def combo_loss(logits_nchw, targets_nhw, *, coeffs=(1.0, 0.5), delta=1.0):
    n, c, h, w = logits_nchw.shape
    hw = h * w
    total = n * hw

    # ---- VMEM-aware tile budget (v7x: 64 MiB physical; v5e/v6e: 128 MiB) ----
    try:
        vmem_cap = int(pltpu.get_tpu_info().vmem_capacity_bytes)
    except Exception:
        vmem_cap = 64 * 1024 * 1024
    vmem_limit = min((vmem_cap * 3) // 4, 100 * 1024 * 1024)
    pipe_budget = vmem_limit // 2                  # for the double-buffered inputs
    x_item = jnp.dtype(logits_nchw.dtype).itemsize
    row_bytes = _LANE * (c * x_item + 4)           # logits + int32 target per row
    tq_cap = max(8, min(_MAX_TQ, (pipe_budget // (2 * row_bytes)) // 8 * 8))

    # ---- pixel-axis padding / tiling (pad granularity stays at 8x128) ----
    q = -(-hw // _LANE)
    n_chunks = 1
    if q > 8:
        q = -(-q // 8) * 8
        if n == 1 and q >= 64:                     # give v7x's 2nd TensorCore work
            n_chunks = 2
            q = -(-q // 16) * 16
    q_chunk = q // n_chunks
    if q_chunk <= tq_cap:
        tq = q_chunk                               # full extent -> always layout-legal
    else:
        tq = _largest_divisor_tile(q_chunk, tq_cap)
        if tq < 64:                                # pathological divisor: pad to cap
            q_chunk = -(-q_chunk // tq_cap) * tq_cap
            q = q_chunk * n_chunks
            tq = tq_cap

    hw_pad = q * _LANE
    pad = hw_pad - hw

    # Feed NCHW directly (class-major / pixel-minor is already lane-dense);
    # keep the incoming logits dtype (bf16 inputs halve the dominant HBM traffic).
    x = logits_nchw.reshape(n, c, hw)
    t = targets_nhw.reshape(n, hw).astype(jnp.int32)
    if pad:
        x = jnp.pad(x, ((0, 0), (0, 0), (0, pad)))
        t = jnp.pad(t, ((0, 0), (0, pad)), constant_values=-1)
    x = x.reshape(n, c, n_chunks, q_chunk, _LANE)
    t = t.reshape(n, n_chunks, q_chunk, _LANE)

    # In-kernel strip height (caps vreg pressure independent of tile size).
    if tq % 32 == 0:
        rs = 32
    elif tq % 16 == 0:
        rs = 16
    elif tq % 8 == 0:
        rs = 8
    else:
        rs = tq
    n_strips = tq // rs
    n_steps = q_chunk // tq

    kernel = functools.partial(
        _combo_loss_kernel,
        coeffs=tuple(float(co) for co in coeffs),
        delta=float(delta),
        num_classes=c,
        rs=rs,
        n_strips=n_strips,
    )

    partials = pl.pallas_call(
        kernel,
        out_shape=jax.ShapeDtypeStruct((n, n_chunks, 1, _LANE), jnp.float32),
        grid_spec=pltpu.PrefetchScalarGridSpec(
            num_scalar_prefetch=0,
            grid=(n, n_chunks, n_steps),
            in_specs=[
                pl.BlockSpec((pl.Squeezed(), c, pl.Squeezed(), tq, _LANE),
                             lambda b, ch, s: (b, 0, ch, s, 0)),
                pl.BlockSpec((pl.Squeezed(), pl.Squeezed(), tq, _LANE),
                             lambda b, ch, s: (b, ch, s, 0)),
            ],
            out_specs=pl.BlockSpec((pl.Squeezed(), pl.Squeezed(), 1, _LANE),
                                   lambda b, ch, s: (b, ch, 0, 0)),
            scratch_shapes=[pltpu.VMEM((rs, _LANE), jnp.float32)],
        ),
        compiler_params=pltpu.CompilerParams(
            dimension_semantics=("parallel", "parallel", "arbitrary"),
            vmem_limit_bytes=vmem_limit),
    )(x, t)

    # Tiny final combine in the wrapper (per-(batch,chunk) lane partials).
    return jnp.sum(partials) / jnp.float32(total)


def combo_loss_ref(logits_nchw, targets_nhw, *, coeffs=(1.0, 0.5), delta=1.0):
    """Pure-JAX reference mirroring the PyTorch module."""
    x = jnp.transpose(logits_nchw, (0, 2, 3, 1)).astype(jnp.float32)  # N,H,W,C
    t = targets_nhw.astype(jnp.int32)
    lse = jax.nn.logsumexp(x, axis=-1)
    picked = jnp.take_along_axis(x, t[..., None], axis=-1)[..., 0]
    ce = jnp.mean(lse - picked)
    am = jnp.argmax(x, axis=-1).astype(jnp.float32)
    d = am - t.astype(jnp.float32)
    ad = jnp.abs(d)
    hub = jnp.mean(jnp.where(ad <= delta, 0.5 * d * d, delta * (ad - 0.5 * delta)))
    return coeffs[0] * ce + coeffs[1] * hub


if __name__ == "__main__":
    key = jax.random.PRNGKey(0)
    k1, k2 = jax.random.split(key)
    N, C, H, W = 2, 4, 16, 16
    logits = jax.random.normal(k1, (N, C, H, W), dtype=jnp.float32)   # inputs (NCHW)
    targets = jax.random.randint(k2, (N, H, W), 0, C, dtype=jnp.int32)

    out = combo_loss(logits, targets)
    out = jax.block_until_ready(out)

    ref = combo_loss_ref(logits, targets)
    assert jnp.allclose(out, ref, atol=1e-5, rtol=1e-5), (out, ref)
    print("KERNEL_OK")
</pallas_src>

<mosaic_0001>
module attributes {stable_mosaic.version = 11 : i64} {
  func.func @_combo_loss_kernel(%arg0: i32, %arg1: i32, %arg2: i32, %arg3: memref<1x4x1x2x128xf32, #tpu.memory_space<vmem>>, %arg4: memref<1x1x2x128xi32, #tpu.memory_space<vmem>>, %arg5: memref<1x1x1x128xf32, #tpu.memory_space<vmem>>, %arg6: memref<2x128xf32, #tpu.memory_space<vmem>>) attributes {dimension_semantics = [#tpu.dimension_semantics<parallel>, #tpu.dimension_semantics<parallel>, #tpu.dimension_semantics<arbitrary>], iteration_bounds = array<i64: 2, 1, 1>, scalar_prefetch = 0 : i64, scratch_operands = 1 : i64, tpu.core_type = #tpu.core_type<tc>, window_params = [{transform_indices = @transform_0, window_bounds = array<i64: 1, 4, 1, 2, 128>}, {transform_indices = @transform_1, window_bounds = array<i64: 1, 1, 2, 128>}, {transform_indices = @transform_2, window_bounds = array<i64: 1, 1, 1, 128>}]} {
    %c0_i32 = arith.constant 0 : i32
    %0 = arith.cmpi eq, %arg2, %c0_i32 : i32
    %1 = arith.extui %0 : i1 to i32
    %c0_i32_0 = arith.constant 0 : i32
    %2 = arith.cmpi ne, %1, %c0_i32_0 : i32
    scf.if %2 {
      %cst_55 = arith.constant 0.000000e+00 : f32
      %102 = vector.broadcast %cst_55 : f32 to vector<2x128xf32>
      %c0_56 = arith.constant 0 : index
      %c0_57 = arith.constant 0 : index
      %103 = vector.load %arg6[%c0_56, %c0_57] : memref<2x128xf32, #tpu.memory_space<vmem>>, vector<2x128xf32>
      tpu.vector_store %arg6[%c0_56, %c0_57], %102 {strides = array<i32>} : memref<2x128xf32, #tpu.memory_space<vmem>>, vector<2x128xf32>,
    } else {
    }
    %c0_i32_1 = arith.constant 0 : i32
    %c2_i32 = arith.constant 2 : i32
    %3 = arith.muli %c0_i32_1, %c2_i32 : i32
    %4 = tpu.assume_multiple %3, 2 : i32
    %c0 = arith.constant 0 : index
    %c0_2 = arith.constant 0 : index
    %5 = arith.index_cast %4 : i32 to index
    %c0_3 = arith.constant 0 : index
    %6 = vector.load %arg4[%c0, %c0_2, %5, %c0_3] : memref<1x1x2x128xi32, #tpu.memory_space<vmem>>, vector<1x1x2x128xi32>
    %7 = vector.shape_cast %6 : vector<1x1x2x128xi32> to vector<2x128xi32>
    %c0_4 = arith.constant 0 : index
    %c0_5 = arith.constant 0 : index
    %c0_6 = arith.constant 0 : index
    %8 = arith.index_cast %4 : i32 to index
    %c0_7 = arith.constant 0 : index
    %9 = vector.load %arg3[%c0_4, %c0_5, %c0_6, %8, %c0_7] : memref<1x4x1x2x128xf32, #tpu.memory_space<vmem>>, vector<1x1x1x2x128xf32>
    %10 = vector.shape_cast %9 : vector<1x1x1x2x128xf32> to vector<2x128xf32>
    %cst = arith.constant 0.000000e+00 : f32
    %11 = vector.broadcast %cst : f32 to vector<2x128xf32>
    %c0_8 = arith.constant 0 : index
    %c1 = arith.constant 1 : index
    %c0_9 = arith.constant 0 : index
    %12 = arith.index_cast %4 : i32 to index
    %c0_10 = arith.constant 0 : index
    %13 = vector.load %arg3[%c0_8, %c1, %c0_9, %12, %c0_10] : memref<1x4x1x2x128xf32, #tpu.memory_space<vmem>>, vector<1x1x1x2x128xf32>
    %14 = vector.shape_cast %13 : vector<1x1x1x2x128xf32> to vector<2x128xf32>
    %15 = arith.cmpf ogt, %14, %10 : vector<2x128xf32>
    %16 = arith.select %15, %14, %10 : vector<2x128xi1>, vector<2x128xf32>
    %cst_11 = arith.constant 1.000000e+00 : f32
    %17 = vector.broadcast %cst_11 : f32 to vector<2x128xf32>
    %18 = arith.select %15, %17, %11 : vector<2x128xi1>, vector<2x128xf32>
    %c0_12 = arith.constant 0 : index
    %c2 = arith.constant 2 : index
    %c0_13 = arith.constant 0 : index
    %19 = arith.index_cast %4 : i32 to index
    %c0_14 = arith.constant 0 : index
    %20 = vector.load %arg3[%c0_12, %c2, %c0_13, %19, %c0_14] : memref<1x4x1x2x128xf32, #tpu.memory_space<vmem>>, vector<1x1x1x2x128xf32>
    %21 = vector.shape_cast %20 : vector<1x1x1x2x128xf32> to vector<2x128xf32>
    %22 = arith.cmpf ogt, %21, %16 : vector<2x128xf32>
    %23 = arith.select %22, %21, %16 : vector<2x128xi1>, vector<2x128xf32>
    %cst_15 = arith.constant 2.000000e+00 : f32
    %24 = vector.broadcast %cst_15 : f32 to vector<2x128xf32>
    %25 = arith.select %22, %24, %18 : vector<2x128xi1>, vector<2x128xf32>
    %c0_16 = arith.constant 0 : index
    %c3 = arith.constant 3 : index
    %c0_17 = arith.constant 0 : index
    %26 = arith.index_cast %4 : i32 to index
    %c0_18 = arith.constant 0 : index
    %27 = vector.load %arg3[%c0_16, %c3, %c0_17, %26, %c0_18] : memref<1x4x1x2x128xf32, #tpu.memory_space<vmem>>, vector<1x1x1x2x128xf32>
    %28 = vector.shape_cast %27 : vector<1x1x1x2x128xf32> to vector<2x128xf32>
    %29 = arith.cmpf ogt, %28, %23 : vector<2x128xf32>
    %30 = arith.select %29, %28, %23 : vector<2x128xi1>, vector<2x128xf32>
    %cst_19 = arith.constant 3.000000e+00 : f32
    %31 = vector.broadcast %cst_19 : f32 to vector<2x128xf32>
    %32 = arith.select %29, %31, %25 : vector<2x128xi1>, vector<2x128xf32>
    %33 = arith.sitofp %7 : vector<2x128xi32> to vector<2x128xf32>
    %34 = arith.subf %32, %33 : vector<2x128xf32>
    %35 = math.absf %34 : vector<2x128xf32>
    %cst_20 = arith.constant 1.000000e+00 : f32
    %36 = vector.broadcast %cst_20 : f32 to vector<2x128xf32>
    %37 = arith.cmpf ole, %35, %36 : vector<2x128xf32>
    %cst_21 = arith.constant 5.000000e-01 : f32
    %38 = vector.broadcast %cst_21 : f32 to vector<2x128xf32>
    %39 = arith.mulf %38, %34 : vector<2x128xf32>
    %40 = arith.mulf %39, %34 : vector<2x128xf32>
    %cst_22 = arith.constant 5.000000e-01 : f32
    %41 = vector.broadcast %cst_22 : f32 to vector<2x128xf32>
    %42 = arith.subf %35, %41 : vector<2x128xf32>
    %cst_23 = arith.constant 1.000000e+00 : f32
    %43 = vector.broadcast %cst_23 : f32 to vector<2x128xf32>
    %44 = arith.mulf %43, %42 : vector<2x128xf32>
    %45 = arith.select %37, %40, %44 : vector<2x128xi1>, vector<2x128xf32>
    %cst_24 = arith.constant 0.000000e+00 : f32
    %46 = vector.broadcast %cst_24 : f32 to vector<2x128xf32>
    %cst_25 = arith.constant 0.000000e+00 : f32
    %47 = vector.broadcast %cst_25 : f32 to vector<2x128xf32>
    %c0_26 = arith.constant 0 : index
    %c0_27 = arith.constant 0 : index
    %c0_28 = arith.constant 0 : index
    %48 = arith.index_cast %4 : i32 to index
    %c0_29 = arith.constant 0 : index
    %49 = vector.load %arg3[%c0_26, %c0_27, %c0_28, %48, %c0_29] : memref<1x4x1x2x128xf32, #tpu.memory_space<vmem>>, vector<1x1x1x2x128xf32>
    %50 = vector.shape_cast %49 : vector<1x1x1x2x128xf32> to vector<2x128xf32>
    %51 = arith.subf %50, %30 : vector<2x128xf32>
    %52 = math.exp %51 : vector<2x128xf32>
    %53 = arith.addf %46, %52 : vector<2x128xf32>
    %c0_i32_30 = arith.constant 0 : i32
    %54 = vector.broadcast %c0_i32_30 : i32 to vector<2x128xi32>
    %55 = arith.cmpi eq, %7, %54 : vector<2x128xi32>
    %56 = arith.select %55, %50, %47 : vector<2x128xi1>, vector<2x128xf32>
    %c0_31 = arith.constant 0 : index
    %c1_32 = arith.constant 1 : index
    %c0_33 = arith.constant 0 : index
    %57 = arith.index_cast %4 : i32 to index
    %c0_34 = arith.constant 0 : index
    %58 = vector.load %arg3[%c0_31, %c1_32, %c0_33, %57, %c0_34] : memref<1x4x1x2x128xf32, #tpu.memory_space<vmem>>, vector<1x1x1x2x128xf32>
    %59 = vector.shape_cast %58 : vector<1x1x1x2x128xf32> to vector<2x128xf32>
    %60 = arith.subf %59, %30 : vector<2x128xf32>
    %61 = math.exp %60 : vector<2x128xf32>
    %62 = arith.addf %53, %61 : vector<2x128xf32>
    %c1_i32 = arith.constant 1 : i32
    %63 = vector.broadcast %c1_i32 : i32 to vector<2x128xi32>
    %64 = arith.cmpi eq, %7, %63 : vector<2x128xi32>
    %65 = arith.select %64, %59, %56 : vector<2x128xi1>, vector<2x128xf32>
    %c0_35 = arith.constant 0 : index
    %c2_36 = arith.constant 2 : index
    %c0_37 = arith.constant 0 : index
    %66 = arith.index_cast %4 : i32 to index
    %c0_38 = arith.constant 0 : index
    %67 = vector.load %arg3[%c0_35, %c2_36, %c0_37, %66, %c0_38] : memref<1x4x1x2x128xf32, #tpu.memory_space<vmem>>, vector<1x1x1x2x128xf32>
    %68 = vector.shape_cast %67 : vector<1x1x1x2x128xf32> to vector<2x128xf32>
    %69 = arith.subf %68, %30 : vector<2x128xf32>
    %70 = math.exp %69 : vector<2x128xf32>
    %71 = arith.addf %62, %70 : vector<2x128xf32>
    %c2_i32_39 = arith.constant 2 : i32
    %72 = vector.broadcast %c2_i32_39 : i32 to vector<2x128xi32>
    %73 = arith.cmpi eq, %7, %72 : vector<2x128xi32>
    %74 = arith.select %73, %68, %65 : vector<2x128xi1>, vector<2x128xf32>
    %c0_40 = arith.constant 0 : index
    %c3_41 = arith.constant 3 : index
    %c0_42 = arith.constant 0 : index
    %75 = arith.index_cast %4 : i32 to index
    %c0_43 = arith.constant 0 : index
    %76 = vector.load %arg3[%c0_40, %c3_41, %c0_42, %75, %c0_43] : memref<1x4x1x2x128xf32, #tpu.memory_space<vmem>>, vector<1x1x1x2x128xf32>
    %77 = vector.shape_cast %76 : vector<1x1x1x2x128xf32> to vector<2x128xf32>
    %78 = arith.subf %77, %30 : vector<2x128xf32>
    %79 = math.exp %78 : vector<2x128xf32>
    %80 = arith.addf %71, %79 : vector<2x128xf32>
    %c3_i32 = arith.constant 3 : i32
    %81 = vector.broadcast %c3_i32 : i32 to vector<2x128xi32>
    %82 = arith.cmpi eq, %7, %81 : vector<2x128xi32>
    %83 = arith.select %82, %77, %74 : vector<2x128xi1>, vector<2x128xf32>
    %84 = math.log %80 : vector<2x128xf32>
    %85 = arith.addf %84, %30 : vector<2x128xf32>
    %86 = arith.subf %85, %83 : vector<2x128xf32>
    %c0_i32_44 = arith.constant 0 : i32
    %87 = vector.broadcast %c0_i32_44 : i32 to vector<2x128xi32>
    %88 = arith.cmpi sge, %7, %87 : vector<2x128xi32>
    %cst_45 = arith.constant 1.000000e+00 : f32
    %89 = vector.broadcast %cst_45 : f32 to vector<2x128xf32>
    %90 = arith.mulf %89, %86 : vector<2x128xf32>
    %cst_46 = arith.constant 5.000000e-01 : f32
    %91 = vector.broadcast %cst_46 : f32 to vector<2x128xf32>
    %92 = arith.mulf %91, %45 : vector<2x128xf32>
    %93 = arith.addf %90, %92 : vector<2x128xf32>
    %cst_47 = arith.constant 0.000000e+00 : f32
    %94 = vector.broadcast %cst_47 : f32 to vector<2x128xf32>
    %95 = arith.select %88, %93, %94 : vector<2x128xi1>, vector<2x128xf32>
    %c0_48 = arith.constant 0 : index
    %c0_49 = arith.constant 0 : index
    %96 = vector.load %arg6[%c0_48, %c0_49] : memref<2x128xf32, #tpu.memory_space<vmem>>, vector<2x128xf32>
    %97 = arith.addf %96, %95 : vector<2x128xf32>
    %c0_50 = arith.constant 0 : index
    %c0_51 = arith.constant 0 : index
    %98 = vector.load %arg6[%c0_50, %c0_51] : memref<2x128xf32, #tpu.memory_space<vmem>>, vector<2x128xf32>
    tpu.vector_store %arg6[%c0_50, %c0_51], %97 {strides = array<i32>} : memref<2x128xf32, #tpu.memory_space<vmem>>, vector<2x128xf32>,
    %c1_i32_52 = arith.constant 1 : i32
    %c0_i32_53 = arith.constant 0 : i32
    %99 = arith.cmpi eq, %arg2, %c0_i32_53 : i32
    %100 = arith.extui %99 : i1 to i32
    %c0_i32_54 = arith.constant 0 : i32
    %101 = arith.cmpi ne, %100, %c0_i32_54 : i32
    scf.if %101 {
      %c0_55 = arith.constant 0 : index
      %c0_56 = arith.constant 0 : index
      %102 = vector.load %arg6[%c0_55, %c0_56] : memref<2x128xf32, #tpu.memory_space<vmem>>, vector<2x128xf32>
      %cst_57 = arith.constant dense<0.000000e+00> : vector<128xf32>
      %103 = vector.multi_reduction <add>, %102, %cst_57 [0] : vector<2x128xf32> to vector<128xf32>
      %104 = vector.shape_cast %103 : vector<128xf32> to vector<1x128xf32>
      %c0_58 = arith.constant 0 : index
      %c0_59 = arith.constant 0 : index
      %c0_60 = arith.constant 0 : index
      %c0_61 = arith.constant 0 : index
      %105 = vector.load %arg5[%c0_58, %c0_59, %c0_60, %c0_61] : memref<1x1x1x128xf32, #tpu.memory_space<vmem>>, vector<1x1x1x128xf32>
      %106 = vector.shape_cast %105 : vector<1x1x1x128xf32> to vector<1x128xf32>
      %107 = vector.shape_cast %104 : vector<1x128xf32> to vector<1x1x1x128xf32>
      tpu.vector_store %arg5[%c0_58, %c0_59, %c0_60, %c0_61], %107 {strides = array<i32>} : memref<1x1x1x128xf32, #tpu.memory_space<vmem>>, vector<1x1x1x128xf32>,
    } else {
    }
    return
  }
  func.func @transform_0(%arg0: i32, %arg1: i32, %arg2: i32) -> (i32, i32, i32, i32, i32) {
    %c0_i32 = arith.constant 0 : i32
    %c0_i32_0 = arith.constant 0 : i32
    %c0_i32_1 = arith.constant 0 : i32
    return %arg0, %c0_i32, %arg1, %arg2, %c0_i32_0 : i32, i32, i32, i32, i32
  }
  func.func @transform_1(%arg0: i32, %arg1: i32, %arg2: i32) -> (i32, i32, i32, i32) {
    %c0_i32 = arith.constant 0 : i32
    %c0_i32_0 = arith.constant 0 : i32
    return %arg0, %arg1, %arg2, %c0_i32 : i32, i32, i32, i32
  }
  func.func @transform_2(%arg0: i32, %arg1: i32, %arg2: i32) -> (i32, i32, i32, i32) {
    %c0_i32 = arith.constant 0 : i32
    %c0_i32_0 = arith.constant 0 : i32
    %c0_i32_1 = arith.constant 0 : i32
    return %arg0, %arg1, %c0_i32, %c0_i32_0 : i32, i32, i32, i32
  }
}

</mosaic_0001>

<bundles_post_ra>
// kernel: tpu_custom_call.1
= control target key start
LH: loop header
LB: loop body
LE: loop exit
PB: predicated region body
PF: predicated region fallthrough
CT: control target
= control target key end

     0   :  { %7 = vsyncpa [#allocation4], 0  ;;  %s847_s0 = inlined_call_operand.hbm [shape: f32[2,4,1,2,128], index: 0, kind: input, shape index: {}]   ;;  %s848_s1 = inlined_call_operand.hbm [shape: s32[2,1,2,128], index: 1, kind: input, shape index: {}]   ;;  %s849_s2 = inlined_call_operand.hbm [shape: f32[2,1,1,128], index: 2, kind: output, shape index: {}]  }
   0x1   :  { %9 = vsyncpa [#allocation4 + $0x1], 0 }
   0x2   :  { %10 = vsyncpa [#allocation7], 0 }
   0x3   :  { %12 = vsyncpa [#allocation7 + $0x1], 0 }
   0x4   :  { %13 = vsyncpa [#allocation5], 0 }
   0x5   :  { %15 = vsyncpa [#allocation5 + $0x1], 0  ;;  %s704_s9 = smov 0   ;;  %s706_s10 = smov 0  }
   0x6   :  { %s708_s11 = smov 0   ;;  %s710_s12 = smov 0  }
   0x7   :  { %s712_s13 = smov 0   ;;  %s714_s14 = smov 0  }
   0x8 LB: > { %s439_s15 = sadd.s32 4294967295, %s684_s14   ;;  %s440_s16 = sadd.s32 4294967294, %s684_s14   ;;  %s684_s14 = sphi %s714_s14, %s21_s14   ;;  %s680_s13 = sphi %s712_s13, %s859_s13   ;;  %s676_s12 = sphi %s710_s12, %s858_s12   ;;  %s672_s11 = sphi %s708_s11, %s857_s11   ;;  %s668_s10 = sphi %s706_s10, %s856_s10   ;;  %s664_s9 = sphi %s704_s9, %s855_s9  }
   0x9   : > { %s40_s17 = sadd.s32 1, %s680_s13  ;;  %s51_s18 = sadd.s32 1, %s672_s11 }
   0xa   : > { %p42_p0 = scmp.ge.s32.totalorder %s40_s17, 2  ;;  %p58_p1 = scmp.ne.s32.totalorder %s672_s11, %s668_s10 }
   0xb   : > { %p59_p2 = scmp.eq.s32.totalorder %s684_s14, 0  ;;  %p64_p3 = scmp.ne.s32.totalorder %s668_s10, %s664_s9 }
   0xc   : > { %s861_s17 = smov (%p42_p0, %s40_s17), 0  ;;  %p65_p5 = scmp.eq.s32.totalorder %s439_s15, 0 }
   0xd   : > { %p745_p4 = por %p59_p2, %p58_p1  ;;  %s44_s20 = ssub.s32 %s680_s13, %s861_s17 }
   0xe   : > { %p120_p6 = scmp.eq.s32.totalorder %s439_s15, 1  ;;  %p49_p7 = scmp.eq.s32.totalorder %s44_s20, 0 }
   0xf   : > { %p751_p8 = por %p65_p5, %p64_p3  ;;  %p126_p10 = scmp.eq.s32.totalorder %s440_s16, 1 }
  0x10   : > { %p755_p9 = por %p120_p6, %p58_p1  ;;  %p442_p12 = scmp.ge.s32.totalorder %s684_s14, 2 }
  0x11   : > { %s760_s23 = scalar_select %p49_p7, %s672_s11, %s51_s18  }
  0x12   : > { %p762_p11 = por %p126_p10, %p64_p3  ;;  %p475_p13 = scmp.lt.s32.totalorder %s684_s14, 2 }
  0x13   : > { %s146_s25 = sand.u32 1, %s672_s11   ;;  %s457_s27 = sshll.u32 %s680_s13, 3 }
  0x14   : > { %s443_s26 = sshll.u32 %s146_s25, 3  ;;  %s157_s30 = scalar_lea.hbm %s847_s0, %s457_s27 }
  0x15   : > { %s150_s3 = scalar_lea.vmem [#allocation3], %s443_s26  ;;  %s158_s5 = sshll.u32 %s157_s30, 4  ;;  %s159_s5 = int_to_ptr.hbm [resolvable:$true] %s158_s5 }
  0x16   : > { %s160_s4 = sshll.u32 %s150_s3, 4  ;;  %p775_p0 = pnand %p475_p13, %p745_p4  ;;  %s161_s4 = int_to_ptr.vmem [resolvable:$true] %s160_s4 }
  0x17   : > { %p448_p1 = scmp.ge.s32.totalorder %s684_s14, 1  ;;  %s147_s7 = scalar_lea.sflag [#allocation4], %s146_s25 }
  0x18   : > { %s686_s8 = smov 32   ;;  %s687_s15 = smov 2  }
  0x19   : > { %467 = dma.hbm_to_vmem [thread:$0]  (!%p775_p0), %s159_s5, 128, %s161_s4, %s147_s7, %s686_s8, %s686_s8, %s687_s15  }
  0x1a   : > { %p189_p2 = scmp.lt.s32.totalorder %s684_s14, 3  ;;  %s446_s16 = sshll.u32 %s146_s25, 1 }
  0x1b   : > { %s447_s18 = sshll.u32 %s680_s13, 1  ;;  %s174_s27 = scalar_lea.vmem [#allocation6], %s446_s16 }
  0x1c   : > { %p190_p3 = pnand %p448_p1, %p189_p2  ;;  %s180_s19 = scalar_lea.hbm %s848_s1, %s447_s18 }
  0x1d   : > { %s184_s28 = sshll.u32 %s174_s27, 4  ;;  %s182_s29 = sshll.u32 %s180_s19, 4  ;;  %s185_s28 = int_to_ptr.vmem [resolvable:$true] %s184_s28  ;;  %s183_s29 = int_to_ptr.hbm [resolvable:$true] %s182_s29 }
  0x1e   : > { %s171_s30 = scalar_lea.sflag [#allocation7], %s146_s25  ;;  %193 = sbr.rel (%p190_p3) target bundleno = 106 (0x6a), region = 28 }
  0x1f   : > { %470 = dma.hbm_to_vmem [thread:$0]  (!%p775_p0), %s183_s29, 32, %s185_s28, %s171_s30  }
  0x20   : > { %s790_s3 = sand.u32 (!%p190_p3), 1, %s668_s10  }
  0x21   : > { %s449_s4 = sshll.u32 (!%p190_p3), %s790_s3, 3  ;;  %s196_s5 = scalar_lea.sflag (!%p190_p3), [#allocation4], %s790_s3 }
  0x22   : > { %s199_s7 = scalar_lea.vmem (!%p190_p3), [#allocation3], %s449_s4 }
  0x23   : > { %651 = dma.done.wait (%p751_p8), %s196_s5, 128  }
  0x24   : > { %653 = vsyncadd (%p751_p8), %s196_s5, 4294967168  ;;  %s450_s25 = sshll.u32 %s790_s3, 1  ;;  %s206_s6 = scalar_lea.sflag [#allocation7], %s790_s3 }
  0x25   : > { %s209_s8 = scalar_lea.vmem [#allocation6], %s450_s25 }
  0x26   : > { %655 = dma.done.wait (%p751_p8), %s206_s6, 32  }
  0x27   : > { %657 = vsyncadd (%p751_p8), %s206_s6, 4294967264  ;;  %v688_v0 = vmov 0.0   ;;  %v241_v1 = vld [vmem:[%s199_s7] sm:$0x3]  ;;  %v451_v2 = vld [vmem:[%s199_s7 + $0x2] sm:$0x3]  ;;  %s326_s16 = scalar_lea.hbm %s849_s2, %s676_s12 }
  0x28   : > { %239 = vst [vmem:[#allocation2] sm:$0x3] %v688_v0  ;;  %vm245_vm0 = vcmp.gt.f32.partialorder %v451_v2, %v241_v1  ;;  %v452_v3 = vld [vmem:[%s199_s7 + $0x4] sm:$0x3]  ;;  %v453_v5 = vld [vmem:[%s199_s7 + $0x6] sm:$0x3] }
  0x29   : > { %v246_v4 = vsel %vm245_vm0, %v451_v2, %v241_v1  ;;  %v247_v12 = vsel %vm245_vm0, 1.0, %v688_v0  ;;  %v240_v17 = vld [vmem:[%s209_s8] sm:$0x3]  ;;  %vm307_vm9 = vcmask 1041408   ;;  %s234_s18 = scalar_lea.vmem [#allocation8], %s790_s3  ;;  %s330_s26 = sshll.u32 %s326_s16, 4  ;;  %s331_s26 = int_to_ptr.hbm [resolvable:$true] %s330_s26 }
  0x2a   : > { %vm251_vm1 = vcmp.gt.f32.partialorder %v452_v3, %v246_v4  ;;  %v260_v19 = vcvt.s32.f32 %v240_v17  ;;  %vm272_vm3 = vcmp.eq.s32.totalorder %v240_v17, 0  ;;  %vm278_vm4 = vcmp.eq.s32.totalorder %v240_v17, 1  ;;  %s328_s20 = sshll.u32 %s234_s18, 4  ;;  %s317_s19 = scalar_lea.sflag [#allocation5], %s790_s3  ;;  %s329_s20 = int_to_ptr.vmem [resolvable:$true] %s328_s20 }
  0x2b   : > { %v252_v6 = vsel %vm251_vm1, %v452_v3, %v246_v4  ;;  %v253_v18 = vsel %vm251_vm1, 2.0, %v247_v12  ;;  %v273_v31 = vsel %vm272_vm3, %v241_v1, 0.0  ;;  %vm284_vm5 = vcmp.eq.s32.totalorder %v240_v17, 2  ;;  %s612_s27 = sshra.s32 %s331_s26, 4  ;;  %s618_s12 = scalar_lea.hbm %s849_s2, 2  ;;  %s613_s27 = int_to_ptr.hbm [resolvable:$true] %s612_s27 }
  0x2c   : > { %vm257_vm2 = vcmp.gt.f32.partialorder %v453_v5, %v252_v6  ;;  %v279_v34 = vsel %vm278_vm4, %v451_v2, %v273_v31  ;;  %vm290_vm7 = vcmp.eq.s32.totalorder %v240_v17, 3  ;;  %vm296_vm8 = vcmp.ge.s32.totalorder %v240_v17, 0  ;;  %s614_s28 = scalar_lea.hbm %s613_s27, 1  ;;  %p619_p7 = scmp.lt.s32.totalorder %s613_s27, %s849_s2 }
  0x2d   : > { %v258_v7 = vsel %vm257_vm2, %v453_v5, %v252_v6  ;;  %v259_v20 = vsel %vm257_vm2, 3.0, %v253_v18  ;;  %v285_v35 = vsel %vm284_vm5, %v452_v3, %v279_v34  ;;  %p615_p4 = scmp.ne.s32.totalorder %s613_s27, %s614_s28  ;;  %p620_p8 = scmp.lt.s32.totalorder %s618_s12, %s614_s28 }
  0x2e   : > { %v268_v8 = vsub.f32 %v241_v1, %v258_v7  ;;  %v274_v9 = vsub.f32 %v451_v2, %v258_v7  ;;  %v280_v10 = vsub.f32 %v452_v3, %v258_v7  ;;  %v286_v11 = vsub.f32 %v453_v5, %v258_v7 }
  0x2f   : > { %v261_v24 = vsub.f32 %v259_v20, %v260_v19  ;;  %v291_v39 = vsel %vm290_vm7, %v453_v5, %v285_v35  ;;  %v300_v44 = vld [vmem:[#allocation2] sm:$0x3]  ;;  %p616_p5 = pnand %p615_p4, %p755_p9  ;;  %p621_p10 = por %p620_p8, %p619_p7 }
  0x30   : > { %v269_v13 = vmul.f32 1.442695, %v268_v8  ;;  %v275_v14 = vmul.f32 1.442695, %v274_v9  ;;  %v281_v15 = vmul.f32 1.442695, %v280_v10 }
  0x31   : > { %v287_v16 = vmul.f32 1.442695, %v286_v11  ;;  %v262_v28 = vand.u32 2147483647, %v261_v24  ;;  %v264_v29 = vmul.f32 0.5, %v261_v24  ;;  %p617_p6 = pneg %p616_p5 }
  0x32   : > { %528 = vpow2.f32 %v269_v13 }
  0x33   : > { %530 = vpow2.f32 %v275_v14  ;;  %v265_v32 = vmul.f32 %v264_v29, %v261_v24  ;;  %v454_v33 = vadd.f32 -0.5, %v262_v28  ;;  %vm263_vm6 = vcmp.le.f32.partialorder %v262_v28, 1.0  ;;  %p622_p13 = pnand %p621_p10, %p617_p6 }
  0x34   : > { %532 = vpow2.f32 %v281_v15 }
  0x35   : > { %534 = vpow2.f32 %v287_v16  ;;  %v267_v37 = vsel %vm263_vm6, %v265_v32, %v454_v33 }
  0x36   : > { %v297_v41 = vmul.f32 0.5, %v267_v37 }
  0x38   : > { %v529_v21 = vpop.eup %528 }
  0x39   : > { %v531_v22 = vpop.eup %530 }
  0x3a   : > { %v533_v23 = vpop.eup %532  ;;  %v277_v25 = vadd.f32 %v531_v22, %v529_v21 }
  0x3b   : > { %v535_v26 = vpop.eup %534 }
  0x3c   : > { %v283_v27 = vadd.f32 %v533_v23, %v277_v25 }
  0x3e   : > { %v289_v30 = vadd.f32 %v535_v26, %v283_v27 }
  0x40   : > { %536 = vlog2.f32 %v289_v30 }
  0x46   : > { %v537_v36 = vpop.eup %536 }
  0x47   : > { %v293_v38 = vmul.f32 0.6931472, %v537_v36 }
  0x49   : > { %v294_v40 = vadd.f32 %v293_v38, %v258_v7 }
  0x4b   : > { %v295_v42 = vsub.f32 %v294_v40, %v291_v39 }
  0x4d   : > { %v298_v43 = vadd.f32 %v297_v41, %v295_v42 }
  0x4f   : > { %v299_v45 = vsel %vm296_vm8, %v298_v43, 0.0 }
  0x50   : > { %v301_v46 = vadd.f32 %v300_v44, %v299_v45 }
  0x52   : > { %302 = vst [vmem:[#allocation2] sm:$0x3] %v301_v46 }
  0x59   : > { %v306_v47 = vld [vmem:[#allocation2] sm:$0x3] }
  0x5a   : > { %v308_v48 = vsel %vm307_vm9, %v306_v47, 0.0 }
  0x5b   : > { %v309_v49 = vrot.slane %v308_v48, 4 }
  0x5d   : > { %v310_v50 = vadd.f32 %v309_v49, %v308_v48 }
  0x5f   : > { %v311_v51 = vrot.slane %v310_v50, 2 }
  0x61   : > { %v312_v52 = vadd.f32 %v311_v51, %v310_v50 }
  0x63   : > { %v313_v53 = vrot.slane %v312_v52, 1 }
  0x65   : > { %v314_v54 = vadd.f32 %v313_v53, %v312_v52 }
  0x67   : > { %315 = vst [vmem:[%s234_s18] sm:$0x1] %v314_v54 }
  0x68   : > { %625 = shalt.err (!%p622_p13)
}
  0x69   : > { %462 = dma.vmem_to_hbm [thread:$0]  (%p755_p9), %s329_s20, 16, %s331_s26, %s317_s19  }
  0x6a PF: > { %s342_s3 = sand.u32 1, %s664_s9   ;;  %p472_p0 = pnand %p442_p12, %p762_p11 }
  0x6b   : > { %s343_s7 = scalar_lea.sflag [#allocation5], %s342_s3 }
  0x6c   : > { %p473_p1 = pneg %p472_p0 }
  0x6e   : > { %659 = dma.done.wait (%p473_p1), %s343_s7, 16  }
  0x6f   : > { %661 = vsyncadd (%p473_p1), %s343_s7, 4294967280  ;;  %s21_s14 = sadd.s32 1, %s684_s14   ;;  %s855_s9 = smov %s668_s10 }
  0x70   : > { %p18_p2 = scmp.ge.s32.totalorder %s21_s14, 4   ;;  %s856_s10 = smov %s672_s11 }
  0x71   : > { %s857_s11 = smov %s760_s23  ;;  %s858_s12 = smov %s680_s13 }
  0x72   : > { %s859_s13 = smov %s861_s17  ;;  %20 = sbr.rel (!%p18_p2) target bundleno = 8 (0x8), region = 97 }
  0x77   :  { %348 = vsyncpa [#allocation4], 1 }
  0x78   :  { %350 = vsyncpa [#allocation4 + $0x1], 1 }
  0x79   :  { %351 = vsyncpa [#allocation7], 1 }
  0x7a   :  { %353 = vsyncpa [#allocation7 + $0x1], 1 }
  0x7b   :  { %354 = vsyncpa [#allocation5], 1 }
  0x7c   :  { %356 = vsyncpa [#allocation5 + $0x1], 1 }

</bundles_post_ra>
